<compile_context>
chip_gen: v5e
topology: v5e:2x2
jax: 0.10.0
libtpu: 0.0.40
codegen_flags: <defaults>
</compile_context>

<pallas_src>
import functools

import jax
import jax.numpy as jnp
from jax.experimental import pallas as pl
from jax.experimental.pallas import tpu as pltpu


# ---------------------- model hyper-parameters (small) ----------------------
BATCH = 2
SEQ_LEN = 8
INPUT_SIZE = 16
HIDDEN_SIZE = 32          # 4*H == 128  -> one gate block == one lane-dense vreg
NUM_LAYERS = 1            # "1H": one bidirectional layer (dropout is a no-op)
OUTPUT_SIZE = 5           # sleep stages
OUT_PAD = 128             # lane-dense padded width of the stored fc output

_VMEM = pl.BlockSpec(memory_space=pltpu.MemorySpace.VMEM)


# ------------------------------ fused kernel --------------------------------

def _bilstm_fc_kernel(x_ref,                 # (B, T, I)   raw batch-first input
                      wcat_ref,              # (I, 8H)     [W_ih_f^T | W_ih_b^T]
                      bcat_ref,              # (1, 8H)     [b_f | b_b] (ih+hh)
                      whh_f_ref,             # (H, 4H)
                      fcw_f_ref, fcw_b_ref,  # (H, OUT_PAD) each
                      fcb_ref,               # (1, OUT_PAD)
                      o_ref,                 # (B, OUT_PAD)
                      *, batch, seq_len, hidden):
    B, T, H = batch, seq_len, hidden
    G = 4 * H

    # ---- one fused input projection for BOTH directions --------------------
    # (B, T, I) -> (B*T, I) is a layout-free leading-dim collapse in VMEM.
    x2 = x_ref[...].reshape(B * T, x_ref.shape[-1])
    xp = jnp.dot(x2, wcat_ref[...],
                 preferred_element_type=jnp.float32) + bcat_ref[...]
    xp = xp.reshape(B, T, 2 * G)          # row b*T + t  ->  xp[b, t, :] (free)

    whh_f = whh_f_ref[...]

    def activations(gates):
        # Full-vreg EUP passes: one tanh for all three sigmoids (tanh identity,
        # no exp / divide) and one tanh for the cell gate, then slice.
        sg = 0.5 * jnp.tanh(0.5 * gates) + 0.5
        tg = jnp.tanh(gates)
        return (sg[:, 0 * H:1 * H],       # i
                sg[:, 1 * H:2 * H],       # f
                tg[:, 2 * H:3 * H],       # g
                sg[:, 3 * H:4 * H])       # o

    # ---- fused zero-state cells: forward t=0  +  the single reverse step ---
    # With zero (h, c): gates == xp (no h @ W_hh) and c = i * g.  The reverse
    # scan starts at t = T-1 with zero state, so lstm_out[:, -1, H:] is exactly
    # one cell step on x_{T-1}; whh_b is therefore never needed.
    g0 = jnp.concatenate([xp[:, 0, :G], xp[:, T - 1, G:]], axis=0)   # (2B, 4H)
    i0, _, gg0, o0 = activations(g0)
    c0 = i0 * gg0
    h0 = o0 * jnp.tanh(c0)
    h_f, c_f = h0[:B], c0[:B]                                        # forward
    h_b = h0[B:]                                                     # reverse

    # ---- forward recurrence, t = 1 .. T-1 (static unroll, T is small) ------
    for t in range(1, T):
        gates = xp[:, t, :G] + jnp.dot(h_f, whh_f,
                                       preferred_element_type=jnp.float32)
        i, f, g, o = activations(gates)
        c_f = f * c_f + i * g
        h_f = o * jnp.tanh(c_f)

    # ---- fc head: split-weight matmuls avoid the [h_f | h_b] lane concat ---
    o_ref[...] = (jnp.dot(h_f, fcw_f_ref[...], preferred_element_type=jnp.float32)
                  + jnp.dot(h_b, fcw_b_ref[...], preferred_element_type=jnp.float32)
                  + fcb_ref[...])


# --------------------------- parameters / wrapper ----------------------------

def init_params(key):
    """Parameters in PyTorch layout (nn.LSTM / nn.Linear default init)."""
    ks = jax.random.split(key, 10)
    H, I, O = HIDDEN_SIZE, INPUT_SIZE, OUTPUT_SIZE

    def uni(k, shape, fan):
        b = 1.0 / jnp.sqrt(float(fan))
        return jax.random.uniform(k, shape, jnp.float32, -b, b)

    return {
        # forward direction (weight_*_l0)
        "w_ih_f": uni(ks[0], (4 * H, I), H),
        "w_hh_f": uni(ks[1], (4 * H, H), H),
        "b_ih_f": uni(ks[2], (4 * H,), H),
        "b_hh_f": uni(ks[3], (4 * H,), H),
        # reverse direction (weight_*_l0_reverse)
        "w_ih_b": uni(ks[4], (4 * H, I), H),
        "w_hh_b": uni(ks[5], (4 * H, H), H),
        "b_ih_b": uni(ks[6], (4 * H,), H),
        "b_hh_b": uni(ks[7], (4 * H,), H),
        # fc: nn.Linear(2H, O)
        "fc_w": uni(ks[8], (O, 2 * H), 2 * H),
        "fc_b": uni(ks[9], (O,), 2 * H),
    }


def prepare_params(p):
    """One-time host-side repack of the PyTorch params for the kernel."""
    H, O = HIDDEN_SIZE, OUTPUT_SIZE
    # fused input-projection weight/bias for both directions: (I, 8H), (1, 8H)
    wcat = jnp.concatenate([p["w_ih_f"].T, p["w_ih_b"].T], axis=1)
    bcat = jnp.concatenate([p["b_ih_f"] + p["b_hh_f"],
                            p["b_ih_b"] + p["b_hh_b"]]).reshape(1, 8 * H)
    # fc weight split per direction, transposed and zero-padded to 128 lanes
    fcw = p["fc_w"].T                                            # (2H, O)
    fcw_f = jnp.zeros((H, OUT_PAD), jnp.float32).at[:, :O].set(fcw[:H])
    fcw_b = jnp.zeros((H, OUT_PAD), jnp.float32).at[:, :O].set(fcw[H:])
    fcb = jnp.zeros((1, OUT_PAD), jnp.float32).at[0, :O].set(p["fc_b"])
    return {"wcat": wcat, "bcat": bcat, "whh_f": p["w_hh_f"].T,
            "fcw_f": fcw_f, "fcw_b": fcw_b, "fcb": fcb}


def forward(kparams, x):
    """Fused BiLSTM (1 layer, bidirectional) + Linear head; x is (B, T, I)."""
    B, T, _ = x.shape
    out_pad = pl.pallas_call(
        functools.partial(_bilstm_fc_kernel, batch=B, seq_len=T,
                          hidden=HIDDEN_SIZE),
        out_shape=jax.ShapeDtypeStruct((B, OUT_PAD), jnp.float32),
        in_specs=[_VMEM] * 7,
        out_specs=_VMEM,
    )(x, kparams["wcat"], kparams["bcat"], kparams["whh_f"],
      kparams["fcw_f"], kparams["fcw_b"], kparams["fcb"])
    # Module semantics require (B, output_size); downstream consumers that can
    # take the lane-padded (B, 128) slab should use out_pad directly.
    return out_pad[:, :OUTPUT_SIZE]


# ------------------------------ pure-JAX reference ---------------------------

def reference_forward(p, x):
    """PyTorch-semantics BiLSTM + fc reference (HIGHEST-precision dots)."""
    hp = jax.lax.Precision.HIGHEST
    B, T, _ = x.shape
    H = HIDDEN_SIZE

    def run_dir(xs, w_ih, w_hh, b_ih, b_hh):
        h = jnp.zeros((B, H), jnp.float32)
        c = jnp.zeros((B, H), jnp.float32)
        outs = []
        for t in range(T):
            g = (jnp.dot(xs[:, t, :], w_ih.T, precision=hp) + b_ih
                 + jnp.dot(h, w_hh.T, precision=hp) + b_hh)
            i = jax.nn.sigmoid(g[:, 0 * H:1 * H])
            f = jax.nn.sigmoid(g[:, 1 * H:2 * H])
            gg = jnp.tanh(g[:, 2 * H:3 * H])
            o = jax.nn.sigmoid(g[:, 3 * H:4 * H])
            c = f * c + i * gg
            h = o * jnp.tanh(c)
            outs.append(h)
        return jnp.stack(outs, axis=1)                     # (B, T, H)

    out_f = run_dir(x, p["w_ih_f"], p["w_hh_f"], p["b_ih_f"], p["b_hh_f"])
    out_b = run_dir(x[:, ::-1, :], p["w_ih_b"], p["w_hh_b"],
                    p["b_ih_b"], p["b_hh_b"])[:, ::-1, :]
    lstm_out = jnp.concatenate([out_f, out_b], axis=-1)    # (B, T, 2H)
    last = lstm_out[:, -1, :]
    return jnp.dot(last, p["fc_w"].T, precision=hp) + p["fc_b"]


# ------------------------------------ main -----------------------------------

if __name__ == "__main__":
    x = jax.random.normal(jax.random.PRNGKey(0),
                          (BATCH, SEQ_LEN, INPUT_SIZE), dtype=jnp.float32)
    params = init_params(jax.random.PRNGKey(42))
    kparams = prepare_params(params)

    out = jax.block_until_ready(jax.jit(forward)(kparams, x))
    assert out.shape == (BATCH, OUTPUT_SIZE), out.shape
    assert out.dtype == jnp.float32

    ref = jax.block_until_ready(reference_forward(params, x))
    err = float(jnp.max(jnp.abs(out - ref)))
    assert jnp.allclose(out, ref, rtol=1e-3, atol=1e-3), err

    print("KERNEL_OK")
</pallas_src>

<mosaic_0001>
module attributes {stable_mosaic.version = 11 : i64} {
  func.func @_bilstm_fc_kernel(%arg0: memref<2x8x16xf32, #tpu.memory_space<vmem>>, %arg1: memref<16x256xf32, #tpu.memory_space<vmem>>, %arg2: memref<1x256xf32, #tpu.memory_space<vmem>>, %arg3: memref<32x128xf32, #tpu.memory_space<vmem>>, %arg4: memref<32x128xf32, #tpu.memory_space<vmem>>, %arg5: memref<32x128xf32, #tpu.memory_space<vmem>>, %arg6: memref<1x128xf32, #tpu.memory_space<vmem>>, %arg7: memref<2x128xf32, #tpu.memory_space<vmem>>) attributes {dimension_semantics = [], scalar_prefetch = 0 : i64, scratch_operands = 0 : i64, tpu.core_type = #tpu.core_type<tc>} {
    %c0 = arith.constant 0 : index
    %c0_0 = arith.constant 0 : index
    %c0_1 = arith.constant 0 : index
    %0 = vector.load %arg0[%c0, %c0_0, %c0_1] : memref<2x8x16xf32, #tpu.memory_space<vmem>>, vector<2x8x16xf32>
    %1 = vector.shape_cast %0 : vector<2x8x16xf32> to vector<16x16xf32>
    %c0_2 = arith.constant 0 : index
    %c0_3 = arith.constant 0 : index
    %2 = vector.load %arg1[%c0_2, %c0_3] : memref<16x256xf32, #tpu.memory_space<vmem>>, vector<16x256xf32>
    %cst = arith.constant dense<0.000000e+00> : vector<16x256xf32>
    %3 = tpu.matmul %1, %2, %cst {dimension_numbers = #tpu.dot_dimension_numbers<[1], [0], [0], [1], [0, 0, 1, 1], [], []>} : vector<16x16xf32>, vector<16x256xf32>, vector<16x256xf32> -> vector<16x256xf32>
    %c0_4 = arith.constant 0 : index
    %c0_5 = arith.constant 0 : index
    %4 = vector.load %arg2[%c0_4, %c0_5] : memref<1x256xf32, #tpu.memory_space<vmem>>, vector<1x256xf32>
    %5 = vector.broadcast %4 : vector<1x256xf32> to vector<16x256xf32>
    %6 = arith.addf %3, %5 : vector<16x256xf32>
    %7 = vector.shape_cast %6 : vector<16x256xf32> to vector<2x8x256xf32>
    %c0_6 = arith.constant 0 : index
    %c0_7 = arith.constant 0 : index
    %8 = vector.load %arg3[%c0_6, %c0_7] : memref<32x128xf32, #tpu.memory_space<vmem>>, vector<32x128xf32>
    %9 = vector.extract_strided_slice %7 {offsets = [0, 0, 0], sizes = [2, 1, 128], strides = [1, 1, 1]} : vector<2x8x256xf32> to vector<2x1x128xf32>
    %10 = vector.shape_cast %9 : vector<2x1x128xf32> to vector<2x128xf32>
    %11 = vector.extract_strided_slice %7 {offsets = [0, 7, 128], sizes = [2, 1, 128], strides = [1, 1, 1]} : vector<2x8x256xf32> to vector<2x1x128xf32>
    %12 = vector.shape_cast %11 : vector<2x1x128xf32> to vector<2x128xf32>
    %13 = tpu.concatenate %10, %12 in 0 : vector<2x128xf32>, vector<2x128xf32> -> vector<4x128xf32>
    %cst_8 = arith.constant 5.000000e-01 : f32
    %14 = vector.broadcast %cst_8 : f32 to vector<4x128xf32>
    %15 = arith.mulf %14, %13 : vector<4x128xf32>
    %16 = math.tanh %15 : vector<4x128xf32>
    %cst_9 = arith.constant 5.000000e-01 : f32
    %17 = vector.broadcast %cst_9 : f32 to vector<4x128xf32>
    %18 = arith.mulf %17, %16 : vector<4x128xf32>
    %cst_10 = arith.constant 5.000000e-01 : f32
    %19 = vector.broadcast %cst_10 : f32 to vector<4x128xf32>
    %20 = arith.addf %18, %19 : vector<4x128xf32>
    %21 = math.tanh %13 : vector<4x128xf32>
    %22 = vector.extract_strided_slice %20 {offsets = [0, 0], sizes = [4, 32], strides = [1, 1]} : vector<4x128xf32> to vector<4x32xf32>
    %23 = vector.extract_strided_slice %21 {offsets = [0, 64], sizes = [4, 32], strides = [1, 1]} : vector<4x128xf32> to vector<4x32xf32>
    %24 = vector.extract_strided_slice %20 {offsets = [0, 96], sizes = [4, 32], strides = [1, 1]} : vector<4x128xf32> to vector<4x32xf32>
    %25 = arith.mulf %22, %23 : vector<4x32xf32>
    %26 = math.tanh %25 : vector<4x32xf32>
    %27 = arith.mulf %24, %26 : vector<4x32xf32>
    %28 = vector.extract_strided_slice %27 {offsets = [0, 0], sizes = [2, 32], strides = [1, 1]} : vector<4x32xf32> to vector<2x32xf32>
    %29 = vector.extract_strided_slice %25 {offsets = [0, 0], sizes = [2, 32], strides = [1, 1]} : vector<4x32xf32> to vector<2x32xf32>
    %30 = vector.extract_strided_slice %27 {offsets = [2, 0], sizes = [2, 32], strides = [1, 1]} : vector<4x32xf32> to vector<2x32xf32>
    %31 = vector.extract_strided_slice %7 {offsets = [0, 1, 0], sizes = [2, 1, 128], strides = [1, 1, 1]} : vector<2x8x256xf32> to vector<2x1x128xf32>
    %32 = vector.shape_cast %31 : vector<2x1x128xf32> to vector<2x128xf32>
    %cst_11 = arith.constant dense<0.000000e+00> : vector<2x128xf32>
    %33 = tpu.matmul %28, %8, %cst_11 {dimension_numbers = #tpu.dot_dimension_numbers<[1], [0], [0], [1], [0, 0, 1, 1], [], []>} : vector<2x32xf32>, vector<32x128xf32>, vector<2x128xf32> -> vector<2x128xf32>
    %34 = arith.addf %32, %33 : vector<2x128xf32>
    %cst_12 = arith.constant 5.000000e-01 : f32
    %35 = vector.broadcast %cst_12 : f32 to vector<2x128xf32>
    %36 = arith.mulf %35, %34 : vector<2x128xf32>
    %37 = math.tanh %36 : vector<2x128xf32>
    %cst_13 = arith.constant 5.000000e-01 : f32
    %38 = vector.broadcast %cst_13 : f32 to vector<2x128xf32>
    %39 = arith.mulf %38, %37 : vector<2x128xf32>
    %cst_14 = arith.constant 5.000000e-01 : f32
    %40 = vector.broadcast %cst_14 : f32 to vector<2x128xf32>
    %41 = arith.addf %39, %40 : vector<2x128xf32>
    %42 = math.tanh %34 : vector<2x128xf32>
    %43 = vector.extract_strided_slice %41 {offsets = [0, 0], sizes = [2, 32], strides = [1, 1]} : vector<2x128xf32> to vector<2x32xf32>
    %44 = vector.extract_strided_slice %41 {offsets = [0, 32], sizes = [2, 32], strides = [1, 1]} : vector<2x128xf32> to vector<2x32xf32>
    %45 = vector.extract_strided_slice %42 {offsets = [0, 64], sizes = [2, 32], strides = [1, 1]} : vector<2x128xf32> to vector<2x32xf32>
    %46 = vector.extract_strided_slice %41 {offsets = [0, 96], sizes = [2, 32], strides = [1, 1]} : vector<2x128xf32> to vector<2x32xf32>
    %47 = arith.mulf %44, %29 : vector<2x32xf32>
    %48 = arith.mulf %43, %45 : vector<2x32xf32>
    %49 = arith.addf %47, %48 : vector<2x32xf32>
    %50 = math.tanh %49 : vector<2x32xf32>
    %51 = arith.mulf %46, %50 : vector<2x32xf32>
    %52 = vector.extract_strided_slice %7 {offsets = [0, 2, 0], sizes = [2, 1, 128], strides = [1, 1, 1]} : vector<2x8x256xf32> to vector<2x1x128xf32>
    %53 = vector.shape_cast %52 : vector<2x1x128xf32> to vector<2x128xf32>
    %cst_15 = arith.constant dense<0.000000e+00> : vector<2x128xf32>
    %54 = tpu.matmul %51, %8, %cst_15 {dimension_numbers = #tpu.dot_dimension_numbers<[1], [0], [0], [1], [0, 0, 1, 1], [], []>} : vector<2x32xf32>, vector<32x128xf32>, vector<2x128xf32> -> vector<2x128xf32>
    %55 = arith.addf %53, %54 : vector<2x128xf32>
    %cst_16 = arith.constant 5.000000e-01 : f32
    %56 = vector.broadcast %cst_16 : f32 to vector<2x128xf32>
    %57 = arith.mulf %56, %55 : vector<2x128xf32>
    %58 = math.tanh %57 : vector<2x128xf32>
    %cst_17 = arith.constant 5.000000e-01 : f32
    %59 = vector.broadcast %cst_17 : f32 to vector<2x128xf32>
    %60 = arith.mulf %59, %58 : vector<2x128xf32>
    %cst_18 = arith.constant 5.000000e-01 : f32
    %61 = vector.broadcast %cst_18 : f32 to vector<2x128xf32>
    %62 = arith.addf %60, %61 : vector<2x128xf32>
    %63 = math.tanh %55 : vector<2x128xf32>
    %64 = vector.extract_strided_slice %62 {offsets = [0, 0], sizes = [2, 32], strides = [1, 1]} : vector<2x128xf32> to vector<2x32xf32>
    %65 = vector.extract_strided_slice %62 {offsets = [0, 32], sizes = [2, 32], strides = [1, 1]} : vector<2x128xf32> to vector<2x32xf32>
    %66 = vector.extract_strided_slice %63 {offsets = [0, 64], sizes = [2, 32], strides = [1, 1]} : vector<2x128xf32> to vector<2x32xf32>
    %67 = vector.extract_strided_slice %62 {offsets = [0, 96], sizes = [2, 32], strides = [1, 1]} : vector<2x128xf32> to vector<2x32xf32>
    %68 = arith.mulf %65, %49 : vector<2x32xf32>
    %69 = arith.mulf %64, %66 : vector<2x32xf32>
    %70 = arith.addf %68, %69 : vector<2x32xf32>
    %71 = math.tanh %70 : vector<2x32xf32>
    %72 = arith.mulf %67, %71 : vector<2x32xf32>
    %73 = vector.extract_strided_slice %7 {offsets = [0, 3, 0], sizes = [2, 1, 128], strides = [1, 1, 1]} : vector<2x8x256xf32> to vector<2x1x128xf32>
    %74 = vector.shape_cast %73 : vector<2x1x128xf32> to vector<2x128xf32>
    %cst_19 = arith.constant dense<0.000000e+00> : vector<2x128xf32>
    %75 = tpu.matmul %72, %8, %cst_19 {dimension_numbers = #tpu.dot_dimension_numbers<[1], [0], [0], [1], [0, 0, 1, 1], [], []>} : vector<2x32xf32>, vector<32x128xf32>, vector<2x128xf32> -> vector<2x128xf32>
    %76 = arith.addf %74, %75 : vector<2x128xf32>
    %cst_20 = arith.constant 5.000000e-01 : f32
    %77 = vector.broadcast %cst_20 : f32 to vector<2x128xf32>
    %78 = arith.mulf %77, %76 : vector<2x128xf32>
    %79 = math.tanh %78 : vector<2x128xf32>
    %cst_21 = arith.constant 5.000000e-01 : f32
    %80 = vector.broadcast %cst_21 : f32 to vector<2x128xf32>
    %81 = arith.mulf %80, %79 : vector<2x128xf32>
    %cst_22 = arith.constant 5.000000e-01 : f32
    %82 = vector.broadcast %cst_22 : f32 to vector<2x128xf32>
    %83 = arith.addf %81, %82 : vector<2x128xf32>
    %84 = math.tanh %76 : vector<2x128xf32>
    %85 = vector.extract_strided_slice %83 {offsets = [0, 0], sizes = [2, 32], strides = [1, 1]} : vector<2x128xf32> to vector<2x32xf32>
    %86 = vector.extract_strided_slice %83 {offsets = [0, 32], sizes = [2, 32], strides = [1, 1]} : vector<2x128xf32> to vector<2x32xf32>
    %87 = vector.extract_strided_slice %84 {offsets = [0, 64], sizes = [2, 32], strides = [1, 1]} : vector<2x128xf32> to vector<2x32xf32>
    %88 = vector.extract_strided_slice %83 {offsets = [0, 96], sizes = [2, 32], strides = [1, 1]} : vector<2x128xf32> to vector<2x32xf32>
    %89 = arith.mulf %86, %70 : vector<2x32xf32>
    %90 = arith.mulf %85, %87 : vector<2x32xf32>
    %91 = arith.addf %89, %90 : vector<2x32xf32>
    %92 = math.tanh %91 : vector<2x32xf32>
    %93 = arith.mulf %88, %92 : vector<2x32xf32>
    %94 = vector.extract_strided_slice %7 {offsets = [0, 4, 0], sizes = [2, 1, 128], strides = [1, 1, 1]} : vector<2x8x256xf32> to vector<2x1x128xf32>
    %95 = vector.shape_cast %94 : vector<2x1x128xf32> to vector<2x128xf32>
    %cst_23 = arith.constant dense<0.000000e+00> : vector<2x128xf32>
    %96 = tpu.matmul %93, %8, %cst_23 {dimension_numbers = #tpu.dot_dimension_numbers<[1], [0], [0], [1], [0, 0, 1, 1], [], []>} : vector<2x32xf32>, vector<32x128xf32>, vector<2x128xf32> -> vector<2x128xf32>
    %97 = arith.addf %95, %96 : vector<2x128xf32>
    %cst_24 = arith.constant 5.000000e-01 : f32
    %98 = vector.broadcast %cst_24 : f32 to vector<2x128xf32>
    %99 = arith.mulf %98, %97 : vector<2x128xf32>
    %100 = math.tanh %99 : vector<2x128xf32>
    %cst_25 = arith.constant 5.000000e-01 : f32
    %101 = vector.broadcast %cst_25 : f32 to vector<2x128xf32>
    %102 = arith.mulf %101, %100 : vector<2x128xf32>
    %cst_26 = arith.constant 5.000000e-01 : f32
    %103 = vector.broadcast %cst_26 : f32 to vector<2x128xf32>
    %104 = arith.addf %102, %103 : vector<2x128xf32>
    %105 = math.tanh %97 : vector<2x128xf32>
    %106 = vector.extract_strided_slice %104 {offsets = [0, 0], sizes = [2, 32], strides = [1, 1]} : vector<2x128xf32> to vector<2x32xf32>
    %107 = vector.extract_strided_slice %104 {offsets = [0, 32], sizes = [2, 32], strides = [1, 1]} : vector<2x128xf32> to vector<2x32xf32>
    %108 = vector.extract_strided_slice %105 {offsets = [0, 64], sizes = [2, 32], strides = [1, 1]} : vector<2x128xf32> to vector<2x32xf32>
    %109 = vector.extract_strided_slice %104 {offsets = [0, 96], sizes = [2, 32], strides = [1, 1]} : vector<2x128xf32> to vector<2x32xf32>
    %110 = arith.mulf %107, %91 : vector<2x32xf32>
    %111 = arith.mulf %106, %108 : vector<2x32xf32>
    %112 = arith.addf %110, %111 : vector<2x32xf32>
    %113 = math.tanh %112 : vector<2x32xf32>
    %114 = arith.mulf %109, %113 : vector<2x32xf32>
    %115 = vector.extract_strided_slice %7 {offsets = [0, 5, 0], sizes = [2, 1, 128], strides = [1, 1, 1]} : vector<2x8x256xf32> to vector<2x1x128xf32>
    %116 = vector.shape_cast %115 : vector<2x1x128xf32> to vector<2x128xf32>
    %cst_27 = arith.constant dense<0.000000e+00> : vector<2x128xf32>
    %117 = tpu.matmul %114, %8, %cst_27 {dimension_numbers = #tpu.dot_dimension_numbers<[1], [0], [0], [1], [0, 0, 1, 1], [], []>} : vector<2x32xf32>, vector<32x128xf32>, vector<2x128xf32> -> vector<2x128xf32>
    %118 = arith.addf %116, %117 : vector<2x128xf32>
    %cst_28 = arith.constant 5.000000e-01 : f32
    %119 = vector.broadcast %cst_28 : f32 to vector<2x128xf32>
    %120 = arith.mulf %119, %118 : vector<2x128xf32>
    %121 = math.tanh %120 : vector<2x128xf32>
    %cst_29 = arith.constant 5.000000e-01 : f32
    %122 = vector.broadcast %cst_29 : f32 to vector<2x128xf32>
    %123 = arith.mulf %122, %121 : vector<2x128xf32>
    %cst_30 = arith.constant 5.000000e-01 : f32
    %124 = vector.broadcast %cst_30 : f32 to vector<2x128xf32>
    %125 = arith.addf %123, %124 : vector<2x128xf32>
    %126 = math.tanh %118 : vector<2x128xf32>
    %127 = vector.extract_strided_slice %125 {offsets = [0, 0], sizes = [2, 32], strides = [1, 1]} : vector<2x128xf32> to vector<2x32xf32>
    %128 = vector.extract_strided_slice %125 {offsets = [0, 32], sizes = [2, 32], strides = [1, 1]} : vector<2x128xf32> to vector<2x32xf32>
    %129 = vector.extract_strided_slice %126 {offsets = [0, 64], sizes = [2, 32], strides = [1, 1]} : vector<2x128xf32> to vector<2x32xf32>
    %130 = vector.extract_strided_slice %125 {offsets = [0, 96], sizes = [2, 32], strides = [1, 1]} : vector<2x128xf32> to vector<2x32xf32>
    %131 = arith.mulf %128, %112 : vector<2x32xf32>
    %132 = arith.mulf %127, %129 : vector<2x32xf32>
    %133 = arith.addf %131, %132 : vector<2x32xf32>
    %134 = math.tanh %133 : vector<2x32xf32>
    %135 = arith.mulf %130, %134 : vector<2x32xf32>
    %136 = vector.extract_strided_slice %7 {offsets = [0, 6, 0], sizes = [2, 1, 128], strides = [1, 1, 1]} : vector<2x8x256xf32> to vector<2x1x128xf32>
    %137 = vector.shape_cast %136 : vector<2x1x128xf32> to vector<2x128xf32>
    %cst_31 = arith.constant dense<0.000000e+00> : vector<2x128xf32>
    %138 = tpu.matmul %135, %8, %cst_31 {dimension_numbers = #tpu.dot_dimension_numbers<[1], [0], [0], [1], [0, 0, 1, 1], [], []>} : vector<2x32xf32>, vector<32x128xf32>, vector<2x128xf32> -> vector<2x128xf32>
    %139 = arith.addf %137, %138 : vector<2x128xf32>
    %cst_32 = arith.constant 5.000000e-01 : f32
    %140 = vector.broadcast %cst_32 : f32 to vector<2x128xf32>
    %141 = arith.mulf %140, %139 : vector<2x128xf32>
    %142 = math.tanh %141 : vector<2x128xf32>
    %cst_33 = arith.constant 5.000000e-01 : f32
    %143 = vector.broadcast %cst_33 : f32 to vector<2x128xf32>
    %144 = arith.mulf %143, %142 : vector<2x128xf32>
    %cst_34 = arith.constant 5.000000e-01 : f32
    %145 = vector.broadcast %cst_34 : f32 to vector<2x128xf32>
    %146 = arith.addf %144, %145 : vector<2x128xf32>
    %147 = math.tanh %139 : vector<2x128xf32>
    %148 = vector.extract_strided_slice %146 {offsets = [0, 0], sizes = [2, 32], strides = [1, 1]} : vector<2x128xf32> to vector<2x32xf32>
    %149 = vector.extract_strided_slice %146 {offsets = [0, 32], sizes = [2, 32], strides = [1, 1]} : vector<2x128xf32> to vector<2x32xf32>
    %150 = vector.extract_strided_slice %147 {offsets = [0, 64], sizes = [2, 32], strides = [1, 1]} : vector<2x128xf32> to vector<2x32xf32>
    %151 = vector.extract_strided_slice %146 {offsets = [0, 96], sizes = [2, 32], strides = [1, 1]} : vector<2x128xf32> to vector<2x32xf32>
    %152 = arith.mulf %149, %133 : vector<2x32xf32>
    %153 = arith.mulf %148, %150 : vector<2x32xf32>
    %154 = arith.addf %152, %153 : vector<2x32xf32>
    %155 = math.tanh %154 : vector<2x32xf32>
    %156 = arith.mulf %151, %155 : vector<2x32xf32>
    %157 = vector.extract_strided_slice %7 {offsets = [0, 7, 0], sizes = [2, 1, 128], strides = [1, 1, 1]} : vector<2x8x256xf32> to vector<2x1x128xf32>
    %158 = vector.shape_cast %157 : vector<2x1x128xf32> to vector<2x128xf32>
    %cst_35 = arith.constant dense<0.000000e+00> : vector<2x128xf32>
    %159 = tpu.matmul %156, %8, %cst_35 {dimension_numbers = #tpu.dot_dimension_numbers<[1], [0], [0], [1], [0, 0, 1, 1], [], []>} : vector<2x32xf32>, vector<32x128xf32>, vector<2x128xf32> -> vector<2x128xf32>
    %160 = arith.addf %158, %159 : vector<2x128xf32>
    %cst_36 = arith.constant 5.000000e-01 : f32
    %161 = vector.broadcast %cst_36 : f32 to vector<2x128xf32>
    %162 = arith.mulf %161, %160 : vector<2x128xf32>
    %163 = math.tanh %162 : vector<2x128xf32>
    %cst_37 = arith.constant 5.000000e-01 : f32
    %164 = vector.broadcast %cst_37 : f32 to vector<2x128xf32>
    %165 = arith.mulf %164, %163 : vector<2x128xf32>
    %cst_38 = arith.constant 5.000000e-01 : f32
    %166 = vector.broadcast %cst_38 : f32 to vector<2x128xf32>
    %167 = arith.addf %165, %166 : vector<2x128xf32>
    %168 = math.tanh %160 : vector<2x128xf32>
    %169 = vector.extract_strided_slice %167 {offsets = [0, 0], sizes = [2, 32], strides = [1, 1]} : vector<2x128xf32> to vector<2x32xf32>
    %170 = vector.extract_strided_slice %167 {offsets = [0, 32], sizes = [2, 32], strides = [1, 1]} : vector<2x128xf32> to vector<2x32xf32>
    %171 = vector.extract_strided_slice %168 {offsets = [0, 64], sizes = [2, 32], strides = [1, 1]} : vector<2x128xf32> to vector<2x32xf32>
    %172 = vector.extract_strided_slice %167 {offsets = [0, 96], sizes = [2, 32], strides = [1, 1]} : vector<2x128xf32> to vector<2x32xf32>
    %173 = arith.mulf %170, %154 : vector<2x32xf32>
    %174 = arith.mulf %169, %171 : vector<2x32xf32>
    %175 = arith.addf %173, %174 : vector<2x32xf32>
    %176 = math.tanh %175 : vector<2x32xf32>
    %177 = arith.mulf %172, %176 : vector<2x32xf32>
    %c0_39 = arith.constant 0 : index
    %c0_40 = arith.constant 0 : index
    %178 = vector.load %arg4[%c0_39, %c0_40] : memref<32x128xf32, #tpu.memory_space<vmem>>, vector<32x128xf32>
    %cst_41 = arith.constant dense<0.000000e+00> : vector<2x128xf32>
    %179 = tpu.matmul %177, %178, %cst_41 {dimension_numbers = #tpu.dot_dimension_numbers<[1], [0], [0], [1], [0, 0, 1, 1], [], []>} : vector<2x32xf32>, vector<32x128xf32>, vector<2x128xf32> -> vector<2x128xf32>
    %c0_42 = arith.constant 0 : index
    %c0_43 = arith.constant 0 : index
    %180 = vector.load %arg5[%c0_42, %c0_43] : memref<32x128xf32, #tpu.memory_space<vmem>>, vector<32x128xf32>
    %cst_44 = arith.constant dense<0.000000e+00> : vector<2x128xf32>
    %181 = tpu.matmul %30, %180, %cst_44 {dimension_numbers = #tpu.dot_dimension_numbers<[1], [0], [0], [1], [0, 0, 1, 1], [], []>} : vector<2x32xf32>, vector<32x128xf32>, vector<2x128xf32> -> vector<2x128xf32>
    %182 = arith.addf %179, %181 : vector<2x128xf32>
    %c0_45 = arith.constant 0 : index
    %c0_46 = arith.constant 0 : index
    %183 = vector.load %arg6[%c0_45, %c0_46] : memref<1x128xf32, #tpu.memory_space<vmem>>, vector<1x128xf32>
    %184 = vector.broadcast %183 : vector<1x128xf32> to vector<2x128xf32>
    %185 = arith.addf %182, %184 : vector<2x128xf32>
    %c0_47 = arith.constant 0 : index
    %c0_48 = arith.constant 0 : index
    %186 = vector.load %arg7[%c0_47, %c0_48] : memref<2x128xf32, #tpu.memory_space<vmem>>, vector<2x128xf32>
    tpu.vector_store %arg7[%c0_47, %c0_48], %185 {strides = array<i32>} : memref<2x128xf32, #tpu.memory_space<vmem>>, vector<2x128xf32>,
    return
  }
}

</mosaic_0001>

<bundles_post_ra>
// kernel: forward.1
= control target key start
LH: loop header
LB: loop body
LE: loop exit
PB: predicated region body
PF: predicated region fallthrough
CT: control target
= control target key end

     0   :  { %12 = vsyncpa [#allocation3], 0  ;;  %s1414_s0 = inlined_call_operand.hbm [shape: f32[2,8,16], index: 0, kind: input, shape index: {}]   ;;  %s1415_s1 = inlined_call_operand.hbm [shape: f32[16,256], index: 1, kind: input, shape index: {}]   ;;  %s1416_s2 = inlined_call_operand.hbm [shape: f32[1,256], index: 2, kind: input, shape index: {}]   ;;  %s1417_s3 = inlined_call_operand.hbm [shape: f32[32,128], index: 3, kind: input, shape index: {}]   ;;  %s1418_s4 = inlined_call_operand.hbm [shape: f32[32,128], index: 4, kind: input, shape index: {}]   ;;  %s1419_s5 = inlined_call_operand.hbm [shape: f32[32,128], index: 5, kind: input, shape index: {}]   ;;  %s1420_s6 = inlined_call_operand.hbm [shape: f32[1,128], index: 6, kind: input, shape index: {}]   ;;  %s1421_s7 = inlined_call_operand.hbm [shape: f32[2,128], index: 7, kind: output, shape index: {}]  }
   0x1   :  { %13 = vsyncpa [#allocation6], 0 }
   0x2   :  { %14 = vsyncpa [#allocation9], 0 }
   0x3   :  { %15 = vsyncpa [#allocation12], 0  ;;  %s34_s26 = sshll.u32 %s1415_s1, 4  ;;  %s35_s26 = int_to_ptr.hbm [resolvable:$true] %s34_s26 }
   0x4   :  { %16 = vsyncpa [#allocation4], 0  ;;  %s1240_s27 = smov [#allocation5]   ;;  %s1241_s29 = smov 256  }
   0x5   :  { %s36_s28 = sshll.u32 %s1240_s27, 4  ;;  %s1242_s30 = smov 16   ;;  %s37_s28 = int_to_ptr.vmem [resolvable:$true] %s36_s28 }
   0x6   :  { %42 = dma.hbm_to_vmem [thread:$0]  %s35_s26, 512, %s37_s28, [#allocation6], %s1241_s29, %s1241_s29, %s1242_s30  }
   0x7   :  { %s58_s10 = sshll.u32 %s1417_s3, 4  ;;  %s1243_s11 = smov [#allocation8]   ;;  %s59_s10 = int_to_ptr.hbm [resolvable:$true] %s58_s10 }
   0x8   :  { %s60_s12 = sshll.u32 %s1243_s11, 4  ;;  %s84_s15 = sshll.u32 %s1419_s5, 4  ;;  %s61_s12 = int_to_ptr.vmem [resolvable:$true] %s60_s12  ;;  %s85_s15 = int_to_ptr.hbm [resolvable:$true] %s84_s15 }
   0x9   :  { %s1244_s1 = smov 128   ;;  %s1245_s16 = smov 8  }
   0xa   :  { %66 = dma.hbm_to_vmem [thread:$0]  %s59_s10, 512, %s61_s12, [#allocation9], %s1244_s1, %s1244_s1, %s1245_s16  }
   0xb   :  { %s21_s19 = sshll.u32 %s1414_s0, 4  ;;  %s1246_s20 = smov [#allocation11]   ;;  %s22_s19 = int_to_ptr.hbm [resolvable:$true] %s21_s19 }
   0xc   :  { %s86_s21 = sshll.u32 %s1246_s20, 4  ;;  %s1247_s3 = smov [#allocation2]   ;;  %s87_s21 = int_to_ptr.vmem [resolvable:$true] %s86_s21 }
   0xd   :  { %92 = dma.hbm_to_vmem [thread:$0]  %s85_s15, 512, %s87_s21, [#allocation12], %s1244_s1, %s1244_s1, %s1245_s16  }
   0xe   :  { %s23_s22 = sshll.u32 %s1247_s3, 4  ;;  %s48_s5 = sshll.u32 %s1416_s2, 4  ;;  %s24_s22 = int_to_ptr.vmem [resolvable:$true] %s23_s22  ;;  %s49_s5 = int_to_ptr.hbm [resolvable:$true] %s48_s5 }
   0xf   :  { %29 = dma.hbm_to_vmem [thread:$0]  %s22_s19, 256, %s24_s22, [#allocation3], %s1244_s1, %s1244_s1, %s1245_s16  }
  0x10   :  { %s71_s27 = sshll.u32 %s1418_s4, 4  ;;  %s1248_s28 = smov [#allocation7]   ;;  %s72_s27 = int_to_ptr.hbm [resolvable:$true] %s71_s27 }
  0x11   :  { %s50_s0 = sshll.u32 %s1248_s28, 4  ;;  %s1249_s29 = smov [#allocation10]   ;;  %s51_s0 = int_to_ptr.vmem [resolvable:$true] %s50_s0 }
  0x12   :  { %53 = dma.hbm_to_vmem [thread:$0]  %s49_s5, 32, %s51_s0, [#allocation6]  }
  0x13   :  { %s73_s30 = sshll.u32 %s1249_s29, 4  ;;  %s98_s10 = sshll.u32 %s1420_s6, 4  ;;  %s74_s30 = int_to_ptr.vmem [resolvable:$true] %s73_s30  ;;  %s99_s10 = int_to_ptr.hbm [resolvable:$true] %s98_s10 }
  0x14   :  { %79 = dma.hbm_to_vmem [thread:$0]  %s72_s27, 512, %s74_s30, [#allocation9], %s1244_s1, %s1244_s1, %s1245_s16  }
  0x15   :  { %s1250_s2 = smov [#allocation13]  }
  0x16   :  { %s100_s11 = sshll.u32 %s1250_s2, 4  ;;  %s101_s11 = int_to_ptr.vmem [resolvable:$true] %s100_s11 }
  0x17   :  { %103 = dma.hbm_to_vmem [thread:$0]  %s99_s10, 16, %s101_s11, [#allocation12]  }
  0x18   :  { %1230 = dma.done.wait [#allocation3], 256  }
  0x19   :  { %1231 = vsyncadd [#allocation3], 4294967040 }
  0x1a   :  { %1232 = dma.done.wait [#allocation6], 544  }
  0x1b   :  { %1233 = vsyncadd [#allocation6], 4294966752 }
  0x1c   :  { %1234 = dma.done.wait [#allocation9], 1024  }
  0x1d   :  { %1235 = vsyncadd [#allocation9], 4294966272 }
  0x1e   :  { %1236 = dma.done.wait [#allocation12], 528  }
  0x1f   :  { %1237 = vsyncadd [#allocation12], 4294966768  ;;  %v136_v0 = vld [vmem:[#allocation5 + $0x10] sm:$0xff]  ;;  %v137_v1 = vld [vmem:[#allocation5 + $0x18] sm:$0xff]  ;;  %vm144_vm0 = vcmask 130048   ;;  %vm211_vm1 = vcmask 1043459  }
  0x20   :  { %v134_v2 = vld [vmem:[#allocation5] sm:$0xff]  ;;  %165 = vmatpush.msra.mxu0 %v136_v0  ;;  %188 = vmatpush.msra.mxu1 %v137_v1  ;;  %v135_v3 = vld [vmem:[#allocation5 + $0x8] sm:$0xff]  ;;  %v132_v4 = vld [vmem:[#allocation2] sm:$0xff]  ;;  %vm204_vm2 = vcmask 1041409   ;;  %vm214_vm3 = vcmask 1041408   ;;  %s1251_s4 = smov 64  }
  0x21   :  { %v133_v5 = vld [vmem:[#allocation2 + $0x8] sm:$0xff]  ;;  %v138_v6 = vld [vmem:[#allocation7] sm:$0x3]  ;;  %s1252_s6 = smov 96   ;;  %s1253_s12 = smov 32   ;;  %v198_v33 = vld [vmem:[#allocation8 + $0x8] sm:$0xff] }
  0x22   :  { %166 = vmatpush.msra.mxu0 %v134_v2  ;;  %189 = vmatpush.msra.mxu1 %v135_v3  ;;  %v141_v9 = vperm.slane %v138_v6, 1  ;;  %v140_v10 = vperm.slane %v138_v6, 0  ;;  %v200_v31 = vld [vmem:[#allocation8 + $0x18] sm:$0xff]  ;;  %v199_v32 = vld [vmem:[#allocation8 + $0x10] sm:$0xff]  ;;  %v197_v34 = vld [vmem:[#allocation8] sm:$0xff]  ;;  %vm235_vm4 = vcmask 261120  }
  0x23   :  { %919 = vmatmul.msk.f32.vlgmr.msra.gmra.mxu0 %vm144_vm0, %v132_v4  ;;  %921 = vmatmul.msk.f32.vlgmr.msra.gmra.mxu1 %vm144_vm0, %v132_v4  ;;  %s1254_s13 = smov [#allocation14]   ;;  %s906_s16 = sshll.u32 %s1421_s7, 4  ;;  %s907_s16 = int_to_ptr.hbm [resolvable:$true] %s906_s16 }
  0x24   :  { %250 = vmatpush.msra.mxu2 %v200_v31  ;;  %336 = vmatpush.msra.mxu3 %v200_v31  ;;  %s904_s14 = sshll.u32 %s1254_s13, 4  ;;  %s905_s14 = int_to_ptr.vmem [resolvable:$true] %s904_s14 }
  0x25   :  { %594 = vmatpush.msrb.mxu0 %v200_v31  ;;  %680 = vmatpush.msrb.mxu1 %v200_v31 }
  0x26   :  { %251 = vmatpush.msra.mxu2 %v199_v32  ;;  %337 = vmatpush.msra.mxu3 %v199_v32 }
  0x27   :  { %595 = vmatpush.msrb.mxu0 %v199_v32  ;;  %681 = vmatpush.msrb.mxu1 %v199_v32 }
  0x28   :  { %252 = vmatpush.msra.mxu2 %v198_v33  ;;  %338 = vmatpush.msra.mxu3 %v198_v33 }
  0x29   :  { %596 = vmatpush.msrb.mxu0 %v198_v33  ;;  %682 = vmatpush.msrb.mxu1 %v198_v33 }
  0x2a   :  { %253 = vmatpush.msra.mxu2 %v197_v34  ;;  %339 = vmatpush.msra.mxu3 %v197_v34 }
  0x2b   :  { %920 = vmatmul.msk.f32.gmra.mxu0 %vm144_vm0, %v133_v5  ;;  %922 = vmatmul.msk.f32.gmra.mxu1 %vm144_vm0, %v133_v5 }
  0x2c   :  { %422 = vmatpush.msrb.mxu2 %v200_v31  ;;  %508 = vmatpush.msrb.mxu3 %v200_v31 }
  0x2d   :  { %597 = vmatpush.msrb.mxu0 %v197_v34  ;;  %683 = vmatpush.msrb.mxu1 %v197_v34 }
  0x2e   :  { %423 = vmatpush.msrb.mxu2 %v199_v32  ;;  %509 = vmatpush.msrb.mxu3 %v199_v32 }
  0x30   :  { %424 = vmatpush.msrb.mxu2 %v198_v33  ;;  %510 = vmatpush.msrb.mxu3 %v198_v33 }
  0x32   :  { %425 = vmatpush.msrb.mxu2 %v197_v34  ;;  %511 = vmatpush.msrb.mxu3 %v197_v34 }
  0xa0   :  { %v168_v7 = vpop.f32.mrf.mxu0  ;;  %v191_v8 = vpop.f32.mrf.mxu1 }
  0xa1   :  { %v192_v11 = vadd.f32 %v191_v8, %v141_v9  ;;  %v1318_v16 = vadd.f32 %v168_v7, %v140_v10 }
  0xa3   :  { %v209_v17 = vrot.slane %v192_v11, 5 }
  0xa8   :  { %v171_v12 = vpop.f32.mrf.mxu0  ;;  %v194_v13 = vpop.f32.mrf.mxu1 }
  0xa9   :  { %v1316_v14 = vadd.f32 %v171_v12, %v140_v10  ;;  %v195_v15 = vadd.f32 %v194_v13, %v141_v9 }
  0xab   :  { %v210_v18 = vrot.slane %v195_v15, 4  ;;  %v203_v19 = vrot.slane %v1316_v14, 7 }
  0xad   :  { %v212_v20 = vsel %vm211_vm1, %v210_v18, %v209_v17  ;;  %v205_v21 = vsel %vm204_vm2, %v203_v19, %v1318_v16 }
  0xae   :  { %v215_v22 = vsel %vm214_vm3, %v205_v21, %v212_v20 }
  0xaf   :  { %948 = vtanh.f32 %v215_v22  ;;  %v216_v24 = vmul.f32 0.5, %v215_v22 }
  0xb1   :  { %950 = vtanh.f32 %v216_v24 }
  0xb5   :  { %v949_v23 = vpop.eup %948 }
  0xb6   :  { %222 = vrot.lane.b32.xlu0 %v949_v23, %s1251_s4 }
  0xb7   :  { %v951_v25 = vpop.eup %950 }
  0xb8   :  { %v218_v26 = vmul.f32 0.5, %v951_v25 }
  0xba   :  { %v219_v27 = vadd.f32 0.5, %v218_v26 }
 0x128   :  { %v223_v28 = vpop.permute.xlu0 %222 }
 0x129   :  { %v225_v29 = vmul.f32 %v223_v28, %v219_v27 }
 0x12b   :  { %952 = vtanh.f32 %v225_v29  ;;  %v275_v44 = vrot.slane %v225_v29, 7 }
 0x131   :  { %v953_v30 = vpop.eup %952 }
 0x132   :  { %228 = vrot.lane.b32.xlu0 %v953_v30, %s1252_s6 }
 0x13a   :  { %278 = vrot.lane.b32.xlu0 %v225_v29, %s1253_s12 }
 0x1a4   :  { %v229_v35 = vpop.permute.xlu0 %228 }
 0x1a5   :  { %v1325_v36 = vmul.f32 %v229_v35, %v219_v27 }
 0x1a7   :  { %233 = vrot.lane.b32.xlu1 %v1325_v36, %s1253_s12 }
 0x1ac   :  { %v279_v58 = vpop.permute.xlu0 %278 }
 0x219   :  { %v234_v37 = vpop.permute.xlu1 %233 }
 0x21a   :  { %923 = vmatmul.msk.f32.vlgmr.msra.gmra.mxu2 %vm235_vm4, %v234_v37 }
 0x21b   :  { %766 = vmatpush.msra.mxu2 %v200_v31 }
 0x21d   :  { %767 = vmatpush.msra.mxu2 %v199_v32 }
 0x21f   :  { %768 = vmatpush.msra.mxu2 %v198_v33 }
 0x221   :  { %769 = vmatpush.msra.mxu2 %v197_v34 }
 0x29d   :  { %v255_v38 = vpop.f32.mrf.mxu2 }
 0x29e   :  { %v259_v39 = vrot.slane %v255_v38, 7  ;;  %v263_v40 = vadd.f32 %v255_v38, %v1316_v14 }
 0x2a0   :  { %v262_v41 = vadd.f32 %v259_v39, %v1318_v16  ;;  %954 = vtanh.f32 %v263_v40  ;;  %v265_v45 = vmul.f32 0.5, %v263_v40 }
 0x2a2   :  { %956 = vtanh.f32 %v262_v41  ;;  %v264_v51 = vmul.f32 0.5, %v262_v41 }
 0x2a3   :  { %958 = vtanh.f32 %v265_v45 }
 0x2a4   :  { %960 = vtanh.f32 %v264_v51 }
 0x2a6   :  { %v955_v42 = vpop.eup %954 }
 0x2a7   :  { %288 = vrot.lane.b32.xlu2 %v955_v42, %s1251_s4 }
 0x2a8   :  { %v957_v43 = vpop.eup %956 }
 0x2a9   :  { %286 = vrot.lane.b32.xlu1 %v957_v43, %s1251_s4  ;;  %v959_v46 = vpop.eup %958 }
 0x2aa   :  { %v269_v47 = vmul.f32 0.5, %v959_v46  ;;  %v961_v52 = vpop.eup %960 }
 0x2ab   :  { %v268_v53 = vmul.f32 0.5, %v961_v52 }
 0x2ac   :  { %v271_v48 = vadd.f32 0.5, %v269_v47 }
 0x2ad   :  { %v270_v54 = vadd.f32 0.5, %v268_v53 }
 0x2ae   :  { %v283_v59 = vmul.f32 %v279_v58, %v271_v48 }
 0x2af   :  { %276 = vrot.lane.b32.xlu2 %v275_v44, %s1253_s12 }
 0x301   :  { %v289_v49 = vpop.permute.xlu2 %288 }
 0x302   :  { %v293_v50 = vmul.f32 %v289_v49, %v271_v48 }
 0x304   :  { %298 = vrot.lane.b32.xlu2 %v293_v50, %s1253_s12 }
 0x309   :  { %v277_v57 = vpop.permute.xlu2 %276 }
 0x30a   :  { %v282_v63 = vmul.f32 %v277_v57, %v270_v54 }
 0x31b   :  { %v287_v55 = vpop.permute.xlu1 %286 }
 0x31c   :  { %v292_v56 = vmul.f32 %v287_v55, %v270_v54 }
 0x31e   :  { %296 = vrot.lane.b32.xlu1 %v292_v56, %s1253_s12 }
 0x35e   :  { %v299_v60 = vpop.permute.xlu2 %298 }
 0x35f   :  { %v303_v61 = vadd.f32 %v299_v60, %v283_v59 }
 0x361   :  { %962 = vtanh.f32 %v303_v61  ;;  %v364_v37 = vrot.slane %v303_v61, 7 }
 0x367   :  { %v963_v62 = vpop.eup %962 }
 0x368   :  { %310 = vrot.lane.b32.xlu1 %v963_v62, %s1251_s4 }
 0x390   :  { %v297_v0 = vpop.permute.xlu1 %296 }
 0x391   :  { %v302_v1 = vadd.f32 %v297_v0, %v282_v63 }
 0x393   :  { %964 = vtanh.f32 %v302_v1  ;;  %v363_v31 = vrot.slane %v302_v1, 7 }
 0x399   :  { %v965_v2 = vpop.eup %964 }
 0x39a   :  { %308 = vrot.lane.b32.xlu0 %v965_v2, %s1251_s4 }
 0x3da   :  { %v311_v3 = vpop.permute.xlu1 %310 }
 0x3db   :  { %v315_v6 = vmul.f32 %v311_v3, %v271_v48 }
 0x40c   :  { %v309_v4 = vpop.permute.xlu0 %308 }
 0x40d   :  { %v314_v5 = vmul.f32 %v309_v4, %v270_v54 }
 0x40f   :  { %v318_v7 = vrot.slane %v314_v5, 1 }
 0x411   :  { %v319_v8 = vsel %vm204_vm2, %v315_v6, %v318_v7 }
 0x412   :  { %320 = vrot.lane.b32.xlu2 %v319_v8, %s1253_s12 }
 0x46c   :  { %v321_v9 = vpop.permute.xlu2 %320 }
 0x46d   :  { %924 = vmatmul.msk.f32.vlgmr.msra.gmra.mxu3 %vm235_vm4, %v321_v9 }
 0x4f0   :  { %v341_v10 = vpop.f32.mrf.mxu3 }
 0x4f1   :  { %v345_v11 = vrot.slane %v341_v10, 6  ;;  %v346_v12 = vrot.slane %v341_v10, 7 }
 0x4f3   :  { %v349_v13 = vadd.f32 %v345_v11, %v1318_v16  ;;  %v350_v15 = vadd.f32 %v346_v12, %v1316_v14 }
 0x4f5   :  { %966 = vtanh.f32 %v349_v13  ;;  %v351_v19 = vmul.f32 0.5, %v349_v13  ;;  %v352_v20 = vmul.f32 0.5, %v350_v15 }
 0x4f6   :  { %968 = vtanh.f32 %v350_v15 }
 0x4f7   :  { %970 = vtanh.f32 %v351_v19 }
 0x4f8   :  { %972 = vtanh.f32 %v352_v20 }
 0x4fb   :  { %v967_v17 = vpop.eup %966 }
 0x4fc   :  { %v969_v18 = vpop.eup %968  ;;  %371 = vrot.lane.b32.xlu0 %v967_v17, %s1251_s4 }
 0x4fd   :  { %373 = vrot.lane.b32.xlu1 %v969_v18, %s1251_s4  ;;  %v971_v21 = vpop.eup %970 }
 0x4fe   :  { %v973_v22 = vpop.eup %972  ;;  %v355_v23 = vmul.f32 0.5, %v971_v21 }
 0x4ff   :  { %v356_v24 = vmul.f32 0.5, %v973_v22 }
 0x500   :  { %v357_v25 = vadd.f32 0.5, %v355_v23 }
 0x501   :  { %v358_v26 = vadd.f32 0.5, %v356_v24 }
 0x502   :  { %v367_v32 = vmul.f32 %v363_v31, %v357_v25 }
 0x503   :  { %v368_v38 = vmul.f32 %v364_v37, %v358_v26 }
 0x56e   :  { %v372_v27 = vpop.permute.xlu0 %371 }
 0x56f   :  { %v374_v28 = vpop.permute.xlu1 %373  ;;  %v377_v29 = vmul.f32 %v372_v27, %v357_v25 }
 0x570   :  { %v378_v30 = vmul.f32 %v374_v28, %v358_v26 }
 0x571   :  { %381 = vrot.lane.b32.xlu2 %v377_v29, %s1253_s12 }
 0x572   :  { %383 = vrot.lane.b32.xlu0 %v378_v30, %s1253_s12 }
 0x5cb   :  { %v382_v33 = vpop.permute.xlu2 %381 }
 0x5cc   :  { %v387_v34 = vadd.f32 %v382_v33, %v367_v32 }
 0x5ce   :  { %974 = vtanh.f32 %v387_v34  ;;  %v449_v10 = vrot.slane %v387_v34, 7 }
 0x5d4   :  { %v975_v35 = vpop.eup %974 }
 0x5d5   :  { %393 = vrot.lane.b32.xlu1 %v975_v35, %s1251_s4 }
 0x5e4   :  { %v384_v39 = vpop.permute.xlu0 %383 }
 0x5e5   :  { %v388_v40 = vadd.f32 %v384_v39, %v368_v38 }
 0x5e7   :  { %976 = vtanh.f32 %v388_v40  ;;  %v450_v5 = vrot.slane %v388_v40, 7 }
 0x5ed   :  { %v977_v41 = vpop.eup %976 }
 0x5ee   :  { %395 = vrot.lane.b32.xlu2 %v977_v41, %s1251_s4 }
 0x647   :  { %v394_v42 = vpop.permute.xlu1 %393 }
 0x648   :  { %v396_v43 = vpop.permute.xlu2 %395  ;;  %v399_v44 = vmul.f32 %v394_v42, %v357_v25 }
 0x649   :  { %v400_v45 = vmul.f32 %v396_v43, %v358_v26 }
 0x64a   :  { %v403_v46 = vrot.slane %v399_v44, 2 }
 0x64b   :  { %v404_v47 = vrot.slane %v400_v45, 1 }
 0x64d   :  { %v405_v48 = vsel %vm204_vm2, %v404_v47, %v403_v46 }
 0x64e   :  { %406 = vrot.lane.b32.xlu0 %v405_v48, %s1253_s12 }
 0x6c0   :  { %v407_v49 = vpop.permute.xlu0 %406 }
 0x6c1   :  { %925 = vmatmul.msk.f32.vlgmr.msrb.gmra.mxu2 %vm235_vm4, %v407_v49 }
 0x744   :  { %v427_v50 = vpop.f32.mrf.mxu2 }
 0x745   :  { %v431_v51 = vrot.slane %v427_v50, 5  ;;  %v432_v52 = vrot.slane %v427_v50, 6 }
 0x747   :  { %v435_v53 = vadd.f32 %v431_v51, %v1318_v16  ;;  %v436_v54 = vadd.f32 %v432_v52, %v1316_v14 }
 0x749   :  { %978 = vtanh.f32 %v435_v53  ;;  %v438_v57 = vmul.f32 0.5, %v436_v54  ;;  %v437_v63 = vmul.f32 0.5, %v435_v53 }
 0x74a   :  { %980 = vtanh.f32 %v436_v54 }
 0x74b   :  { %982 = vtanh.f32 %v438_v57 }
 0x74c   :  { %984 = vtanh.f32 %v437_v63 }
 0x74f   :  { %v979_v55 = vpop.eup %978 }
 0x750   :  { %v981_v56 = vpop.eup %980  ;;  %457 = vrot.lane.b32.xlu1 %v979_v55, %s1251_s4 }
 0x751   :  { %459 = vrot.lane.b32.xlu2 %v981_v56, %s1251_s4  ;;  %v983_v58 = vpop.eup %982 }
 0x752   :  { %v442_v59 = vmul.f32 0.5, %v983_v58  ;;  %v985_v0 = vpop.eup %984 }
 0x753   :  { %v441_v1 = vmul.f32 0.5, %v985_v0 }
 0x754   :  { %v444_v60 = vadd.f32 0.5, %v442_v59 }
 0x755   :  { %v443_v2 = vadd.f32 0.5, %v441_v1 }
 0x756   :  { %v454_v6 = vmul.f32 %v450_v5, %v444_v60 }
 0x757   :  { %v453_v11 = vmul.f32 %v449_v10, %v443_v2 }
 0x7ab   :  { %v460_v61 = vpop.permute.xlu2 %459 }
 0x7ac   :  { %v464_v62 = vmul.f32 %v460_v61, %v444_v60 }
 0x7ae   :  { %469 = vrot.lane.b32.xlu1 %v464_v62, %s1253_s12 }
 0x7c2   :  { %v458_v3 = vpop.permute.xlu1 %457 }
 0x7c3   :  { %v463_v4 = vmul.f32 %v458_v3, %v443_v2 }
 0x7c5   :  { %467 = vrot.lane.b32.xlu0 %v463_v4, %s1253_s12 }
 0x820   :  { %v470_v7 = vpop.permute.xlu1 %469 }
 0x821   :  { %v474_v8 = vadd.f32 %v470_v7, %v454_v6 }
 0x823   :  { %986 = vtanh.f32 %v474_v8  ;;  %v536_v46 = vrot.slane %v474_v8, 7 }
 0x829   :  { %v987_v9 = vpop.eup %986 }
 0x82a   :  { %481 = vrot.lane.b32.xlu0 %v987_v9, %s1251_s4 }
 0x837   :  { %v468_v12 = vpop.permute.xlu0 %467 }
 0x838   :  { %v473_v13 = vadd.f32 %v468_v12, %v453_v11 }
 0x83a   :  { %988 = vtanh.f32 %v473_v13  ;;  %v535_v45 = vrot.slane %v473_v13, 7 }
 0x840   :  { %v989_v15 = vpop.eup %988 }
 0x841   :  { %479 = vrot.lane.b32.xlu2 %v989_v15, %s1251_s4 }
 0x89b   :  { %v480_v17 = vpop.permute.xlu2 %479 }
 0x89c   :  { %v482_v18 = vpop.permute.xlu0 %481  ;;  %v485_v19 = vmul.f32 %v480_v17, %v443_v2 }
 0x89d   :  { %v486_v20 = vmul.f32 %v482_v18, %v444_v60 }
 0x89e   :  { %v489_v21 = vrot.slane %v485_v19, 3 }
 0x89f   :  { %v490_v22 = vrot.slane %v486_v20, 2 }
 0x8a1   :  { %v491_v23 = vsel %vm204_vm2, %v490_v22, %v489_v21 }
 0x8a2   :  { %492 = vrot.lane.b32.xlu1 %v491_v23, %s1253_s12 }
 0x914   :  { %v493_v24 = vpop.permute.xlu1 %492 }
 0x915   :  { %926 = vmatmul.msk.f32.vlgmr.msrb.gmra.mxu3 %vm235_vm4, %v493_v24 }
 0x998   :  { %v513_v25 = vpop.f32.mrf.mxu3 }
 0x999   :  { %v517_v26 = vrot.slane %v513_v25, 4  ;;  %v518_v27 = vrot.slane %v513_v25, 5 }
 0x99b   :  { %v521_v28 = vadd.f32 %v517_v26, %v1318_v16  ;;  %v522_v29 = vadd.f32 %v518_v27, %v1316_v14 }
 0x99d   :  { %990 = vtanh.f32 %v521_v28  ;;  %v523_v32 = vmul.f32 0.5, %v521_v28  ;;  %v524_v39 = vmul.f32 0.5, %v522_v29 }
 0x99e   :  { %992 = vtanh.f32 %v522_v29 }
 0x99f   :  { %994 = vtanh.f32 %v523_v32 }
 0x9a0   :  { %996 = vtanh.f32 %v524_v39 }
 0x9a3   :  { %v991_v30 = vpop.eup %990 }
 0x9a4   :  { %v993_v31 = vpop.eup %992  ;;  %543 = vrot.lane.b32.xlu2 %v991_v30, %s1251_s4 }
 0x9a5   :  { %545 = vrot.lane.b32.xlu0 %v993_v31, %s1251_s4  ;;  %v995_v33 = vpop.eup %994 }
 0x9a6   :  { %v527_v34 = vmul.f32 0.5, %v995_v33  ;;  %v997_v40 = vpop.eup %996 }
 0x9a7   :  { %v528_v41 = vmul.f32 0.5, %v997_v40 }
 0x9a8   :  { %v529_v35 = vadd.f32 0.5, %v527_v34 }
 0x9a9   :  { %v530_v42 = vadd.f32 0.5, %v528_v41 }
 0x9aa   :  { %v539_v47 = vmul.f32 %v535_v45, %v529_v35 }
 0x9ab   :  { %v540_v48 = vmul.f32 %v536_v46, %v530_v42 }
 0x9fe   :  { %v544_v37 = vpop.permute.xlu2 %543 }
 0x9ff   :  { %v549_v38 = vmul.f32 %v544_v37, %v529_v35 }
 0xa01   :  { %553 = vrot.lane.b32.xlu1 %v549_v38, %s1253_s12 }
 0xa17   :  { %v546_v43 = vpop.permute.xlu0 %545 }
 0xa18   :  { %v550_v44 = vmul.f32 %v546_v43, %v530_v42 }
 0xa1a   :  { %555 = vrot.lane.b32.xlu2 %v550_v44, %s1253_s12 }
 0xa73   :  { %v554_v49 = vpop.permute.xlu1 %553 }
 0xa74   :  { %v556_v50 = vpop.permute.xlu2 %555  ;;  %v559_v51 = vadd.f32 %v554_v49, %v539_v47 }
 0xa75   :  { %v560_v52 = vadd.f32 %v556_v50, %v540_v48 }
 0xa76   :  { %998 = vtanh.f32 %v559_v51  ;;  %v621_v20 = vrot.slane %v559_v51, 7 }
 0xa77   :  { %1000 = vtanh.f32 %v560_v52  ;;  %v622_v25 = vrot.slane %v560_v52, 7 }
 0xa7c   :  { %v999_v53 = vpop.eup %998 }
 0xa7d   :  { %v1001_v54 = vpop.eup %1000  ;;  %565 = vrot.lane.b32.xlu0 %v999_v53, %s1251_s4 }
 0xa7e   :  { %567 = vrot.lane.b32.xlu1 %v1001_v54, %s1251_s4 }
 0xaef   :  { %v566_v55 = vpop.permute.xlu0 %565 }
 0xaf0   :  { %v568_v56 = vpop.permute.xlu1 %567  ;;  %v571_v57 = vmul.f32 %v566_v55, %v529_v35 }
 0xaf1   :  { %v572_v58 = vmul.f32 %v568_v56, %v530_v42 }
 0xaf2   :  { %v575_v59 = vrot.slane %v571_v57, 4 }
 0xaf3   :  { %v576_v60 = vrot.slane %v572_v58, 3 }
 0xaf5   :  { %v577_v61 = vsel %vm204_vm2, %v576_v60, %v575_v59 }
 0xaf6   :  { %578 = vrot.lane.b32.xlu2 %v577_v61, %s1253_s12 }
 0xb50   :  { %v579_v62 = vpop.permute.xlu2 %578 }
 0xb51   :  { %927 = vmatmul.msk.f32.vlgmr.msrb.gmra.mxu0 %vm235_vm4, %v579_v62 }
 0xbce   :  { %v599_v63 = vpop.f32.mrf.mxu0 }
 0xbcf   :  { %v603_v0 = vrot.slane %v599_v63, 3  ;;  %v604_v1 = vrot.slane %v599_v63, 4 }
 0xbd1   :  { %v607_v2 = vadd.f32 %v603_v0, %v1318_v16  ;;  %v608_v3 = vadd.f32 %v604_v1, %v1316_v14 }
 0xbd3   :  { %1002 = vtanh.f32 %v607_v2  ;;  %v609_v6 = vmul.f32 0.5, %v607_v2  ;;  %v610_v7 = vmul.f32 0.5, %v608_v3 }
 0xbd4   :  { %1004 = vtanh.f32 %v608_v3 }
 0xbd5   :  { %1006 = vtanh.f32 %v609_v6 }
 0xbd6   :  { %1008 = vtanh.f32 %v610_v7 }
 0xbd9   :  { %v1003_v4 = vpop.eup %1002 }
 0xbda   :  { %v1005_v5 = vpop.eup %1004  ;;  %629 = vrot.lane.b32.xlu0 %v1003_v4, %s1251_s4 }
 0xbdb   :  { %631 = vrot.lane.b32.xlu1 %v1005_v5, %s1251_s4  ;;  %v1007_v8 = vpop.eup %1006 }
 0xbdc   :  { %v1009_v9 = vpop.eup %1008  ;;  %v613_v10 = vmul.f32 0.5, %v1007_v8 }
 0xbdd   :  { %v614_v11 = vmul.f32 0.5, %v1009_v9 }
 0xbde   :  { %v615_v12 = vadd.f32 0.5, %v613_v10 }
 0xbdf   :  { %v616_v13 = vadd.f32 0.5, %v614_v11 }
 0xbe0   :  { %v625_v21 = vmul.f32 %v621_v20, %v615_v12 }
 0xbe1   :  { %v626_v26 = vmul.f32 %v622_v25, %v616_v13 }
 0xc4c   :  { %v630_v15 = vpop.permute.xlu0 %629 }
 0xc4d   :  { %v632_v17 = vpop.permute.xlu1 %631  ;;  %v635_v18 = vmul.f32 %v630_v15, %v615_v12 }
 0xc4e   :  { %v636_v19 = vmul.f32 %v632_v17, %v616_v13 }
 0xc4f   :  { %639 = vrot.lane.b32.xlu2 %v635_v18, %s1253_s12 }
 0xc50   :  { %641 = vrot.lane.b32.xlu0 %v636_v19, %s1253_s12 }
 0xca9   :  { %v640_v22 = vpop.permute.xlu2 %639 }
 0xcaa   :  { %v645_v23 = vadd.f32 %v640_v22, %v625_v21 }
 0xcac   :  { %1010 = vtanh.f32 %v645_v23  ;;  %v707_v63 = vrot.slane %v645_v23, 7 }
 0xcb2   :  { %v1011_v24 = vpop.eup %1010 }
 0xcb3   :  { %651 = vrot.lane.b32.xlu1 %v1011_v24, %s1251_s4 }
 0xcc2   :  { %v642_v27 = vpop.permute.xlu0 %641 }
 0xcc3   :  { %v646_v28 = vadd.f32 %v642_v27, %v626_v26 }
 0xcc5   :  { %1012 = vtanh.f32 %v646_v28  ;;  %v708_v58 = vrot.slane %v646_v28, 7 }
 0xccb   :  { %v1013_v29 = vpop.eup %1012 }
 0xccc   :  { %653 = vrot.lane.b32.xlu2 %v1013_v29, %s1251_s4 }
 0xd25   :  { %v652_v30 = vpop.permute.xlu1 %651 }
 0xd26   :  { %v654_v31 = vpop.permute.xlu2 %653  ;;  %v657_v32 = vmul.f32 %v652_v30, %v615_v12 }
 0xd27   :  { %v658_v33 = vmul.f32 %v654_v31, %v616_v13  ;;  %v839_v31 = vrot.slane %v1325_v36, 2 }
 0xd28   :  { %v661_v34 = vrot.slane %v657_v32, 5  ;;  %v838_v32 = vld [vmem:[#allocation11 + $0x18] sm:$0xff] }
 0xd29   :  { %v662_v35 = vrot.slane %v658_v33, 4  ;;  %856 = vmatpush.msra.mxu3 %v838_v32  ;;  %v837_v33 = vld [vmem:[#allocation11 + $0x10] sm:$0xff] }
 0xd2b   :  { %v663_v37 = vsel %vm204_vm2, %v662_v35, %v661_v34  ;;  %v836_v34 = vld [vmem:[#allocation11 + $0x8] sm:$0xff]  ;;  %857 = vmatpush.msra.mxu3 %v837_v33  ;;  %v835_v35 = vld [vmem:[#allocation11] sm:$0xff] }
 0xd2c   :  { %664 = vrot.lane.b32.xlu0 %v663_v37, %s1253_s12 }
 0xd2d   :  { %858 = vmatpush.msra.mxu3 %v836_v34 }
 0xd2f   :  { %859 = vmatpush.msra.mxu3 %v835_v35 }
 0xd9e   :  { %v665_v38 = vpop.permute.xlu0 %664 }
 0xd9f   :  { %928 = vmatmul.msk.f32.vlgmr.msrb.gmra.mxu1 %vm235_vm4, %v665_v38 }
 0xe1c   :  { %v685_v39 = vpop.f32.mrf.mxu1 }
 0xe1d   :  { %v689_v40 = vrot.slane %v685_v39, 2  ;;  %v690_v41 = vrot.slane %v685_v39, 3 }
 0xe1f   :  { %v693_v42 = vadd.f32 %v689_v40, %v1318_v16  ;;  %v694_v43 = vadd.f32 %v690_v41, %v1316_v14 }
 0xe21   :  { %1014 = vtanh.f32 %v693_v42  ;;  %v696_v46 = vmul.f32 0.5, %v694_v43  ;;  %v695_v52 = vmul.f32 0.5, %v693_v42 }
 0xe22   :  { %1016 = vtanh.f32 %v694_v43 }
 0xe23   :  { %1018 = vtanh.f32 %v696_v46 }
 0xe24   :  { %1020 = vtanh.f32 %v695_v52 }
 0xe27   :  { %v1015_v44 = vpop.eup %1014 }
 0xe28   :  { %v1017_v45 = vpop.eup %1016  ;;  %715 = vrot.lane.b32.xlu1 %v1015_v44, %s1251_s4 }
 0xe29   :  { %717 = vrot.lane.b32.xlu2 %v1017_v45, %s1251_s4  ;;  %v1019_v47 = vpop.eup %1018 }
 0xe2a   :  { %v700_v48 = vmul.f32 0.5, %v1019_v47  ;;  %v1021_v53 = vpop.eup %1020  ;;  %v834_v47 = vld [vmem:[#allocation10 + $0x18] sm:$0xff] }
 0xe2b   :  { %v699_v54 = vmul.f32 0.5, %v1021_v53  ;;  %885 = vmatpush.msra.mxu0 %v834_v47 }
 0xe2c   :  { %v702_v49 = vadd.f32 0.5, %v700_v48  ;;  %v833_v48 = vld [vmem:[#allocation10 + $0x10] sm:$0xff] }
 0xe2d   :  { %v701_v55 = vadd.f32 0.5, %v699_v54  ;;  %886 = vmatpush.msra.mxu0 %v833_v48 }
 0xe2e   :  { %v712_v59 = vmul.f32 %v708_v58, %v702_v49 }
 0xe2f   :  { %v711_v0 = vmul.f32 %v707_v63, %v701_v55 }
 0xe83   :  { %v718_v50 = vpop.permute.xlu2 %717 }
 0xe84   :  { %v722_v51 = vmul.f32 %v718_v50, %v702_v49  ;;  %v831_v50 = vld [vmem:[#allocation10] sm:$0xff] }
 0xe86   :  { %727 = vrot.lane.b32.xlu1 %v722_v51, %s1253_s12 }
 0xe9a   :  { %v716_v56 = vpop.permute.xlu1 %715 }
 0xe9b   :  { %v721_v57 = vmul.f32 %v716_v56, %v701_v55 }
 0xe9d   :  { %725 = vrot.lane.b32.xlu0 %v721_v57, %s1253_s12 }
 0xef8   :  { %v728_v60 = vpop.permute.xlu1 %727 }
 0xef9   :  { %v732_v61 = vadd.f32 %v728_v60, %v712_v59  ;;  %v947_v59 = vld [vmem:[#allocation13] ss:$0 sm:$0xff] }
 0xefb   :  { %1022 = vtanh.f32 %v732_v61  ;;  %v794_v38 = vrot.slane %v732_v61, 7 }
 0xf01   :  { %v1023_v62 = vpop.eup %1022 }
 0xf02   :  { %739 = vrot.lane.b32.xlu0 %v1023_v62, %s1251_s4 }
 0xf0f   :  { %v726_v1 = vpop.permute.xlu0 %725 }
 0xf10   :  { %v731_v2 = vadd.f32 %v726_v1, %v711_v0 }
 0xf12   :  { %1024 = vtanh.f32 %v731_v2  ;;  %v793_v37 = vrot.slane %v731_v2, 7 }
 0xf18   :  { %v1025_v3 = vpop.eup %1024 }
 0xf19   :  { %737 = vrot.lane.b32.xlu2 %v1025_v3, %s1251_s4 }
 0xf73   :  { %v738_v4 = vpop.permute.xlu2 %737 }
 0xf74   :  { %v740_v5 = vpop.permute.xlu0 %739  ;;  %v743_v6 = vmul.f32 %v738_v4, %v701_v55 }
 0xf75   :  { %v744_v7 = vmul.f32 %v740_v5, %v702_v49  ;;  %v832_v49 = vld [vmem:[#allocation10 + $0x8] sm:$0xff] }
 0xf76   :  { %v747_v8 = vrot.slane %v743_v6, 6  ;;  %887 = vmatpush.msra.mxu0 %v832_v49 }
 0xf77   :  { %v748_v9 = vrot.slane %v744_v7, 5 }
 0xf78   :  { %888 = vmatpush.msra.mxu0 %v831_v50 }
 0xf79   :  { %v749_v10 = vsel %vm204_vm2, %v748_v9, %v747_v8 }
 0xf7a   :  { %750 = vrot.lane.b32.xlu1 %v749_v10, %s1253_s12 }
 0xfec   :  { %v751_v11 = vpop.permute.xlu1 %750 }
 0xfed   :  { %929 = vmatmul.msk.f32.vlgmr.msra.gmra.mxu2 %vm235_vm4, %v751_v11 }
0x1070   :  { %v771_v12 = vpop.f32.mrf.mxu2 }
0x1071   :  { %v775_v13 = vrot.slane %v771_v12, 1  ;;  %v776_v15 = vrot.slane %v771_v12, 2 }
0x1073   :  { %v779_v17 = vadd.f32 %v775_v13, %v1318_v16  ;;  %v780_v18 = vadd.f32 %v776_v15, %v1316_v14 }
0x1075   :  { %1026 = vtanh.f32 %v779_v17  ;;  %v781_v21 = vmul.f32 0.5, %v779_v17  ;;  %v782_v16 = vmul.f32 0.5, %v780_v18 }
0x1076   :  { %1028 = vtanh.f32 %v780_v18 }
0x1077   :  { %1030 = vtanh.f32 %v781_v21 }
0x1078   :  { %1032 = vtanh.f32 %v782_v16 }
0x107b   :  { %v1027_v19 = vpop.eup %1026 }
0x107c   :  { %v1029_v20 = vpop.eup %1028  ;;  %801 = vrot.lane.b32.xlu2 %v1027_v19, %s1251_s4 }
0x107d   :  { %803 = vrot.lane.b32.xlu0 %v1029_v20, %s1251_s4  ;;  %v1031_v22 = vpop.eup %1030 }
0x107e   :  { %v785_v23 = vmul.f32 0.5, %v1031_v22  ;;  %v1033_v14 = vpop.eup %1032 }
0x107f   :  { %v786_v27 = vmul.f32 0.5, %v1033_v14 }
0x1080   :  { %v787_v24 = vadd.f32 0.5, %v785_v23 }
0x1081   :  { %v788_v28 = vadd.f32 0.5, %v786_v27 }
0x1082   :  { %v797_v39 = vmul.f32 %v793_v37, %v787_v24 }
0x1083   :  { %v798_v40 = vmul.f32 %v794_v38, %v788_v28 }
0x10d6   :  { %v802_v25 = vpop.permute.xlu2 %801 }
0x10d7   :  { %v807_v26 = vmul.f32 %v802_v25, %v787_v24 }
0x10d9   :  { %811 = vrot.lane.b32.xlu1 %v807_v26, %s1253_s12 }
0x10ef   :  { %v804_v29 = vpop.permute.xlu0 %803 }
0x10f0   :  { %v808_v30 = vmul.f32 %v804_v29, %v788_v28 }
0x10f2   :  { %813 = vrot.lane.b32.xlu2 %v808_v30, %s1253_s12 }
0x10fa   :  { %840 = vrot.lane.b32.xlu2 %v839_v31, %s1253_s12 }
0x114b   :  { %v812_v41 = vpop.permute.xlu1 %811 }
0x114c   :  { %v814_v42 = vpop.permute.xlu2 %813  ;;  %v817_v43 = vadd.f32 %v812_v41, %v797_v39 }
0x114d   :  { %v818_v44 = vadd.f32 %v814_v42, %v798_v40 }
0x114e   :  { %1034 = vtanh.f32 %v817_v43 }
0x114f   :  { %1036 = vtanh.f32 %v818_v44 }
0x1154   :  { %v1035_v36 = vpop.eup %1034  ;;  %v841_v45 = vpop.permute.xlu2 %840 }
0x1155   :  { %v1037_v46 = vpop.eup %1036  ;;  %930 = vmatmul.msk.f32.vlgmr.msra.gmra.mxu3 %vm235_vm4, %v841_v45  ;;  %823 = vrot.lane.b32.xlu0 %v1035_v36, %s1251_s4 }
0x1156   :  { %825 = vrot.lane.b32.xlu1 %v1037_v46, %s1251_s4 }
0x11c7   :  { %v824_v51 = vpop.permute.xlu0 %823 }
0x11c8   :  { %v826_v52 = vpop.permute.xlu1 %825  ;;  %v829_v53 = vmul.f32 %v824_v51, %v787_v24 }
0x11c9   :  { %v830_v54 = vmul.f32 %v826_v52, %v788_v28 }
0x11ca   :  { %v866_v55 = vrot.slane %v829_v53, 7 }
0x11cb   :  { %v867_v56 = vrot.slane %v830_v54, 6 }
0x11cd   :  { %v868_v57 = vsel %vm204_vm2, %v867_v56, %v866_v55 }
0x11ce   :  { %869 = vrot.lane.b32.xlu0 %v868_v57, %s1253_s12 }
0x11d8   :  { %v861_v60 = vpop.f32.mrf.mxu3 }
0x1240   :  { %v870_v58 = vpop.permute.xlu0 %869 }
0x1241   :  { %931 = vmatmul.msk.f32.vlgmr.msra.gmra.mxu0 %vm235_vm4, %v870_v58 }
0x12be   :  { %v890_v61 = vpop.f32.mrf.mxu0 }
0x12bf   :  { %v891_v62 = vadd.f32 %v890_v61, %v861_v60 }
0x12c1   :  { %v897_v63 = vadd.f32 %v947_v59, %v891_v62 }
0x12c3   :  { %898 = vst [vmem:[#allocation14] sm:$0x3] %v897_v63 }
0x12c4   :  { %909 = dma.vmem_to_hbm [thread:$0]  %s905_s14, 32, %s907_s16, [#allocation4]  }
0x12c5   :  { %1238 = dma.done.wait [#allocation4], 32  }
0x12c6   :  { %1239 = vsyncadd [#allocation4], 4294967264 }
0x12c7   :  { %914 = vsyncpa [#allocation3], 1 }
0x12c8   :  { %915 = vsyncpa [#allocation6], 1 }
0x12c9   :  { %916 = vsyncpa [#allocation9], 1 }
0x12ca   :  { %917 = vsyncpa [#allocation12], 1 }
0x12cb   :  { %918 = vsyncpa [#allocation4], 1 }

</bundles_post_ra>
